<compile_context>
chip_gen: v7x
topology: tpu7x:2x2x1
jax: 0.10.0
libtpu: 0.0.40
codegen_flags: <defaults>
</compile_context>

<pallas_src>
import jax
import jax.numpy as jnp
from jax import lax
from jax.experimental import pallas as pl
from jax.experimental.pallas import tpu as pltpu


def _downsample_conv_kernel(x_ref, w_ref, o_ref, p_ref, acc_ref):
    # x_ref:   (1, 1, 4*Hh, Wh, Cin)  one padded depth slice; H/W even/odd
    #                                 parity packed as (ph*2+pw)*Hh + h2
    # w_ref:   (9, 3*Cslot, Cout)     rows grouped by (kd*3 + kh), cols (kw, ci)
    # o_ref:   (1, 1, Ho*Wo, Cout)    output tile for (n, do); revisited over kd
    # p_ref:   (3, Ho*Wo, 3*Cslot)    im2col staging, one slot per kh group
    # acc_ref: (Ho*Wo, Cout) f32      accumulator over the kd reduction axis
    kd = pl.program_id(2)

    Cin = x_ref.shape[4]
    Wh = x_ref.shape[3]
    Hh = x_ref.shape[2] // 4
    Ho, Wo = Hh - 1, Wh - 1
    Cslot = p_ref.shape[2] // 3

    @pl.when(kd == 0)
    def _init():
        acc_ref[...] = jnp.zeros_like(acc_ref)

    if Cslot != Cin:
        # Lane-padded tap slots: keep the never-written pad columns at zero so
        # the (zero-weight) matmul rows multiply finite values.
        @pl.when(kd == 0)
        def _zero_pad():
            p_ref[...] = jnp.zeros_like(p_ref)

    # For each kh group: stage 3 contiguous (parity-selected) tap slices into
    # this group's scratch slot, then fire one 2-D MXU matmul with K = 3*Cslot.
    # Group g+1 writes a different p_ref slot than group g's matmul reads, so
    # staging and MXU work of adjacent groups can overlap.
    for kh in range(3):
        ph, sh = kh % 2, kh // 2          # padded h = 2*ho + kh = 2*(ho+sh) + ph
        for kw in range(3):
            pw, sw = kw % 2, kw // 2
            base = (ph * 2 + pw) * Hh + sh
            tap = x_ref[0, 0, base:base + Ho, sw:sw + Wo, :]       # (Ho, Wo, Cin)
            p_ref[kh, :, kw * Cslot:kw * Cslot + Cin] = tap.reshape(Ho * Wo, Cin)
        wk = w_ref[kd * 3 + kh]                                    # (3*Cslot, Cout)
        acc_ref[...] += jnp.dot(p_ref[kh], wk,
                                preferred_element_type=jnp.float32)

    @pl.when(kd == pl.num_programs(2) - 1)
    def _store():
        o_ref[0, 0] = acc_ref[...].astype(o_ref.dtype)


def downsample_conv3d(x, w):
    """x: (N, D, H, W, Cin) NDHWC; w: (3, 3, 3, Cin, Cout). Stride-2, pad-1 conv."""
    N, D, H, W, Cin = x.shape
    Cout = w.shape[-1]
    assert w.shape[:4] == (3, 3, 3, Cin)
    assert D % 2 == 0 and H % 2 == 0 and W % 2 == 0, "even spatial dims expected"
    Do, Ho, Wo = D // 2, H // 2, W // 2
    Dp = D + 2
    Hh, Wh = Ho + 1, Wo + 1

    # Tap-slot width: lane-align (pad to a multiple of 128) for mid-size channel
    # counts so the im2col stores are neither lane-rotated nor masked.  Tiny Cin
    # (toy) and Cin % 128 == 0 need no padding.
    if Cin % 128 == 0 or Cin < 32:
        Cslot = Cin
    else:
        Cslot = ((Cin + 127) // 128) * 128

    # pad=1 plus the even/odd (space-to-depth) repack of H and W in one
    # wrapper-side pass:  x_k[n, d, (ph*2+pw)*Hh + h2, w2, c]
    #   == x_pad[n, d, 2*h2 + ph, 2*w2 + pw, c]
    x_pad = jnp.pad(x, ((0, 0), (1, 1), (1, 1), (1, 1), (0, 0)))
    x_k = (x_pad.reshape(N, Dp, Hh, 2, Wh, 2, Cin)
                .transpose(0, 1, 3, 5, 2, 4, 6)
                .reshape(N, Dp, 4 * Hh, Wh, Cin))

    # Weight repack hoisted out of the kernel (deliberate cast to x.dtype):
    # groups ordered (kd, kh), rows within a group ordered (kw, ci[, pad]).
    w5 = w.astype(x.dtype)
    if Cslot != Cin:
        w5 = jnp.pad(w5, ((0, 0), (0, 0), (0, 0), (0, Cslot - Cin), (0, 0)))
    w3 = w5.reshape(9, 3 * Cslot, Cout)

    itemsize = jnp.dtype(x.dtype).itemsize
    est_bytes = (2 * 4 * Hh * Wh * Cin * itemsize          # x block (double buf)
                 + 2 * 9 * 3 * Cslot * Cout * itemsize     # resident weights
                 + 2 * Ho * Wo * Cout * itemsize           # output block
                 + 3 * Ho * Wo * 3 * Cslot * itemsize      # im2col scratch
                 + Ho * Wo * Cout * 4)                     # f32 accumulator
    vmem_limit = int(min(96 * 2**20, max(32 * 2**20, 2 * est_bytes)))

    # NOTE: kd is the innermost ("arbitrary") reduction axis and the output
    # block index is constant in kd -- do not reorder the grid.
    grid = (N, Do, 3)
    out = pl.pallas_call(
        _downsample_conv_kernel,
        out_shape=jax.ShapeDtypeStruct((N, Do, Ho * Wo, Cout), x.dtype),
        grid_spec=pltpu.PrefetchScalarGridSpec(
            num_scalar_prefetch=0,
            grid=grid,
            in_specs=[
                # one padded depth slice per step; depth halo via index 2*do+kd
                pl.BlockSpec((1, 1, 4 * Hh, Wh, Cin),
                             lambda n, do, kd: (n, 2 * do + kd, 0, 0, 0)),
                # full weights, constant index map -> fetched once, resident
                pl.BlockSpec((9, 3 * Cslot, Cout),
                             lambda n, do, kd: (0, 0, 0)),
            ],
            out_specs=pl.BlockSpec((1, 1, Ho * Wo, Cout),
                                   lambda n, do, kd: (n, do, 0, 0)),
            scratch_shapes=[
                pltpu.VMEM((3, Ho * Wo, 3 * Cslot), x.dtype),   # im2col staging
                pltpu.VMEM((Ho * Wo, Cout), jnp.float32),       # f32 accumulator
            ],
        ),
        compiler_params=pltpu.CompilerParams(
            # N and Do shardable across TensorCores; kd is the reduction.
            dimension_semantics=("parallel", "parallel", "arbitrary"),
            vmem_limit_bytes=vmem_limit),
    )(x_k, w3)
    return out.reshape(N, Do, Ho, Wo, Cout)


def reference_conv3d(x, w):
    # NDHWC / DHWIO conv, stride 2, padding 1, for correctness check.
    return lax.conv_general_dilated(
        x, w,
        window_strides=(2, 2, 2),
        padding=((1, 1), (1, 1), (1, 1)),
        dimension_numbers=("NDHWC", "DHWIO", "NDHWC"),
    )


if __name__ == "__main__":
    key = jax.random.PRNGKey(0)
    kx, kw = jax.random.split(key)

    N, Cin, Cout = 2, 4, 4
    D = H = W = 16

    x = jax.random.normal(kx, (N, D, H, W, Cin), dtype=jnp.float32)
    # Deterministic Kaiming-style init: std = 1/sqrt(fan_in), fan_in = 27*Cin
    fan_in = 3 * 3 * 3 * Cin
    w = jax.random.normal(kw, (3, 3, 3, Cin, Cout), dtype=jnp.float32)
    w = w * (1.0 / (fan_in ** 0.5))

    out = downsample_conv3d(x, w)
    out = jax.block_until_ready(out)

    ref = reference_conv3d(x, w)
    assert out.shape == (N, D // 2, H // 2, W // 2, Cout)
    assert jnp.allclose(out, ref, atol=1e-3, rtol=1e-3), float(
        jnp.max(jnp.abs(out - ref)))

    print("KERNEL_OK")
</pallas_src>

<mosaic_0001>
module attributes {stable_mosaic.version = 11 : i64} {
  func.func @_downsample_conv_kernel(%arg0: i32, %arg1: i32, %arg2: i32, %arg3: memref<1x1x36x9x4xf32, #tpu.memory_space<vmem>>, %arg4: memref<9x12x4xf32, #tpu.memory_space<vmem>>, %arg5: memref<1x1x64x4xf32, #tpu.memory_space<vmem>>, %arg6: memref<3x64x12xf32, #tpu.memory_space<vmem>>, %arg7: memref<64x4xf32, #tpu.memory_space<vmem>>) attributes {dimension_semantics = [#tpu.dimension_semantics<parallel>, #tpu.dimension_semantics<parallel>, #tpu.dimension_semantics<arbitrary>], iteration_bounds = array<i64: 2, 8, 3>, scalar_prefetch = 0 : i64, scratch_operands = 2 : i64, tpu.core_type = #tpu.core_type<tc>, window_params = [{transform_indices = @transform_0, window_bounds = array<i64: 1, 1, 36, 9, 4>}, {pipeline_mode = #tpu.pipeline_mode<synchronous>, transform_indices = @transform_1, window_bounds = array<i64: 9, 12, 4>}, {transform_indices = @transform_2, window_bounds = array<i64: 1, 1, 64, 4>}]} {
    %c0_i32 = arith.constant 0 : i32
    %0 = arith.cmpi eq, %arg2, %c0_i32 : i32
    %1 = arith.extui %0 : i1 to i32
    %c0_i32_0 = arith.constant 0 : i32
    %2 = arith.cmpi ne, %1, %c0_i32_0 : i32
    scf.if %2 {
      %cst_98 = arith.constant 0.000000e+00 : f32
      %93 = vector.broadcast %cst_98 : f32 to vector<64x4xf32>
      %c0_99 = arith.constant 0 : index
      %c0_100 = arith.constant 0 : index
      %94 = vector.load %arg7[%c0_99, %c0_100] : memref<64x4xf32, #tpu.memory_space<vmem>>, vector<64x4xf32>
      tpu.vector_store %arg7[%c0_99, %c0_100], %93 {strides = array<i32>} : memref<64x4xf32, #tpu.memory_space<vmem>>, vector<64x4xf32>,
    } else {
    }
    %c0 = arith.constant 0 : index
    %c0_1 = arith.constant 0 : index
    %c0_2 = arith.constant 0 : index
    %c0_3 = arith.constant 0 : index
    %c0_4 = arith.constant 0 : index
    %3 = vector.load %arg3[%c0, %c0_1, %c0_2, %c0_3, %c0_4] : memref<1x1x36x9x4xf32, #tpu.memory_space<vmem>>, vector<1x1x8x8x4xf32>
    %4 = vector.shape_cast %3 : vector<1x1x8x8x4xf32> to vector<8x8x4xf32>
    %5 = vector.shape_cast %4 : vector<8x8x4xf32> to vector<64x4xf32>
    %c0_5 = arith.constant 0 : index
    %c0_6 = arith.constant 0 : index
    %c0_7 = arith.constant 0 : index
    %6 = vector.load %arg6[%c0_5, %c0_6, %c0_7] : memref<3x64x12xf32, #tpu.memory_space<vmem>>, vector<1x64x4xf32>
    %7 = vector.shape_cast %6 : vector<1x64x4xf32> to vector<64x4xf32>
    %8 = vector.shape_cast %5 : vector<64x4xf32> to vector<1x64x4xf32>
    tpu.vector_store %arg6[%c0_5, %c0_6, %c0_7], %8 {strides = array<i32>} : memref<3x64x12xf32, #tpu.memory_space<vmem>>, vector<1x64x4xf32>,
    %c0_8 = arith.constant 0 : index
    %c0_9 = arith.constant 0 : index
    %c9 = arith.constant 9 : index
    %c0_10 = arith.constant 0 : index
    %c0_11 = arith.constant 0 : index
    %9 = vector.load %arg3[%c0_8, %c0_9, %c9, %c0_10, %c0_11] : memref<1x1x36x9x4xf32, #tpu.memory_space<vmem>>, vector<1x1x8x8x4xf32>
    %10 = vector.shape_cast %9 : vector<1x1x8x8x4xf32> to vector<8x8x4xf32>
    %11 = vector.shape_cast %10 : vector<8x8x4xf32> to vector<64x4xf32>
    %c0_12 = arith.constant 0 : index
    %c0_13 = arith.constant 0 : index
    %c4 = arith.constant 4 : index
    %12 = vector.load %arg6[%c0_12, %c0_13, %c4] : memref<3x64x12xf32, #tpu.memory_space<vmem>>, vector<1x64x4xf32>
    %13 = vector.shape_cast %12 : vector<1x64x4xf32> to vector<64x4xf32>
    %14 = vector.shape_cast %11 : vector<64x4xf32> to vector<1x64x4xf32>
    tpu.vector_store %arg6[%c0_12, %c0_13, %c4], %14 {strides = array<i32>} : memref<3x64x12xf32, #tpu.memory_space<vmem>>, vector<1x64x4xf32>,
    %c0_14 = arith.constant 0 : index
    %c0_15 = arith.constant 0 : index
    %c0_16 = arith.constant 0 : index
    %c1 = arith.constant 1 : index
    %c0_17 = arith.constant 0 : index
    %15 = vector.load %arg3[%c0_14, %c0_15, %c0_16, %c1, %c0_17] : memref<1x1x36x9x4xf32, #tpu.memory_space<vmem>>, vector<1x1x8x8x4xf32>
    %16 = vector.shape_cast %15 : vector<1x1x8x8x4xf32> to vector<8x8x4xf32>
    %17 = vector.shape_cast %16 : vector<8x8x4xf32> to vector<64x4xf32>
    %c0_18 = arith.constant 0 : index
    %c0_19 = arith.constant 0 : index
    %c8 = arith.constant 8 : index
    %18 = vector.load %arg6[%c0_18, %c0_19, %c8] : memref<3x64x12xf32, #tpu.memory_space<vmem>>, vector<1x64x4xf32>
    %19 = vector.shape_cast %18 : vector<1x64x4xf32> to vector<64x4xf32>
    %20 = vector.shape_cast %17 : vector<64x4xf32> to vector<1x64x4xf32>
    tpu.vector_store %arg6[%c0_18, %c0_19, %c8], %20 {strides = array<i32>} : memref<3x64x12xf32, #tpu.memory_space<vmem>>, vector<1x64x4xf32>,
    %c3_i32 = arith.constant 3 : i32
    %21 = arith.muli %arg2, %c3_i32 : i32
    %c0_i32_20 = arith.constant 0 : i32
    %22 = arith.addi %21, %c0_i32_20 : i32
    %23 = arith.index_cast %22 : i32 to index
    %c0_21 = arith.constant 0 : index
    %c0_22 = arith.constant 0 : index
    %24 = vector.load %arg4[%23, %c0_21, %c0_22] : memref<9x12x4xf32, #tpu.memory_space<vmem>>, vector<1x12x4xf32>
    %25 = vector.shape_cast %24 : vector<1x12x4xf32> to vector<12x4xf32>
    %c0_23 = arith.constant 0 : index
    %c0_24 = arith.constant 0 : index
    %26 = vector.load %arg7[%c0_23, %c0_24] : memref<64x4xf32, #tpu.memory_space<vmem>>, vector<64x4xf32>
    %c0_25 = arith.constant 0 : index
    %c0_26 = arith.constant 0 : index
    %c0_27 = arith.constant 0 : index
    %27 = vector.load %arg6[%c0_25, %c0_26, %c0_27] : memref<3x64x12xf32, #tpu.memory_space<vmem>>, vector<1x64x12xf32>
    %28 = vector.shape_cast %27 : vector<1x64x12xf32> to vector<64x12xf32>
    %cst = arith.constant dense<0.000000e+00> : vector<64x4xf32>
    %29 = tpu.matmul %28, %25, %cst {dimension_numbers = #tpu.dot_dimension_numbers<[1], [0], [0], [1], [0, 0, 1, 1], [], []>} : vector<64x12xf32>, vector<12x4xf32>, vector<64x4xf32> -> vector<64x4xf32>
    %30 = arith.addf %26, %29 : vector<64x4xf32>
    %c0_28 = arith.constant 0 : index
    %c0_29 = arith.constant 0 : index
    %31 = vector.load %arg7[%c0_28, %c0_29] : memref<64x4xf32, #tpu.memory_space<vmem>>, vector<64x4xf32>
    tpu.vector_store %arg7[%c0_28, %c0_29], %30 {strides = array<i32>} : memref<64x4xf32, #tpu.memory_space<vmem>>, vector<64x4xf32>,
    %c0_30 = arith.constant 0 : index
    %c0_31 = arith.constant 0 : index
    %c18 = arith.constant 18 : index
    %c0_32 = arith.constant 0 : index
    %c0_33 = arith.constant 0 : index
    %32 = vector.load %arg3[%c0_30, %c0_31, %c18, %c0_32, %c0_33] : memref<1x1x36x9x4xf32, #tpu.memory_space<vmem>>, vector<1x1x8x8x4xf32>
    %33 = vector.shape_cast %32 : vector<1x1x8x8x4xf32> to vector<8x8x4xf32>
    %34 = vector.shape_cast %33 : vector<8x8x4xf32> to vector<64x4xf32>
    %c1_34 = arith.constant 1 : index
    %c0_35 = arith.constant 0 : index
    %c0_36 = arith.constant 0 : index
    %35 = vector.load %arg6[%c1_34, %c0_35, %c0_36] : memref<3x64x12xf32, #tpu.memory_space<vmem>>, vector<1x64x4xf32>
    %36 = vector.shape_cast %35 : vector<1x64x4xf32> to vector<64x4xf32>
    %37 = vector.shape_cast %34 : vector<64x4xf32> to vector<1x64x4xf32>
    tpu.vector_store %arg6[%c1_34, %c0_35, %c0_36], %37 {strides = array<i32>} : memref<3x64x12xf32, #tpu.memory_space<vmem>>, vector<1x64x4xf32>,
    %c0_37 = arith.constant 0 : index
    %c0_38 = arith.constant 0 : index
    %c27 = arith.constant 27 : index
    %c0_39 = arith.constant 0 : index
    %c0_40 = arith.constant 0 : index
    %38 = vector.load %arg3[%c0_37, %c0_38, %c27, %c0_39, %c0_40] : memref<1x1x36x9x4xf32, #tpu.memory_space<vmem>>, vector<1x1x8x8x4xf32>
    %39 = vector.shape_cast %38 : vector<1x1x8x8x4xf32> to vector<8x8x4xf32>
    %40 = vector.shape_cast %39 : vector<8x8x4xf32> to vector<64x4xf32>
    %c1_41 = arith.constant 1 : index
    %c0_42 = arith.constant 0 : index
    %c4_43 = arith.constant 4 : index
    %41 = vector.load %arg6[%c1_41, %c0_42, %c4_43] : memref<3x64x12xf32, #tpu.memory_space<vmem>>, vector<1x64x4xf32>
    %42 = vector.shape_cast %41 : vector<1x64x4xf32> to vector<64x4xf32>
    %43 = vector.shape_cast %40 : vector<64x4xf32> to vector<1x64x4xf32>
    tpu.vector_store %arg6[%c1_41, %c0_42, %c4_43], %43 {strides = array<i32>} : memref<3x64x12xf32, #tpu.memory_space<vmem>>, vector<1x64x4xf32>,
    %c0_44 = arith.constant 0 : index
    %c0_45 = arith.constant 0 : index
    %c18_46 = arith.constant 18 : index
    %c1_47 = arith.constant 1 : index
    %c0_48 = arith.constant 0 : index
    %44 = vector.load %arg3[%c0_44, %c0_45, %c18_46, %c1_47, %c0_48] : memref<1x1x36x9x4xf32, #tpu.memory_space<vmem>>, vector<1x1x8x8x4xf32>
    %45 = vector.shape_cast %44 : vector<1x1x8x8x4xf32> to vector<8x8x4xf32>
    %46 = vector.shape_cast %45 : vector<8x8x4xf32> to vector<64x4xf32>
    %c1_49 = arith.constant 1 : index
    %c0_50 = arith.constant 0 : index
    %c8_51 = arith.constant 8 : index
    %47 = vector.load %arg6[%c1_49, %c0_50, %c8_51] : memref<3x64x12xf32, #tpu.memory_space<vmem>>, vector<1x64x4xf32>
    %48 = vector.shape_cast %47 : vector<1x64x4xf32> to vector<64x4xf32>
    %49 = vector.shape_cast %46 : vector<64x4xf32> to vector<1x64x4xf32>
    tpu.vector_store %arg6[%c1_49, %c0_50, %c8_51], %49 {strides = array<i32>} : memref<3x64x12xf32, #tpu.memory_space<vmem>>, vector<1x64x4xf32>,
    %c3_i32_52 = arith.constant 3 : i32
    %50 = arith.muli %arg2, %c3_i32_52 : i32
    %c1_i32 = arith.constant 1 : i32
    %51 = arith.addi %50, %c1_i32 : i32
    %52 = arith.index_cast %51 : i32 to index
    %c0_53 = arith.constant 0 : index
    %c0_54 = arith.constant 0 : index
    %53 = vector.load %arg4[%52, %c0_53, %c0_54] : memref<9x12x4xf32, #tpu.memory_space<vmem>>, vector<1x12x4xf32>
    %54 = vector.shape_cast %53 : vector<1x12x4xf32> to vector<12x4xf32>
    %c0_55 = arith.constant 0 : index
    %c0_56 = arith.constant 0 : index
    %55 = vector.load %arg7[%c0_55, %c0_56] : memref<64x4xf32, #tpu.memory_space<vmem>>, vector<64x4xf32>
    %c1_57 = arith.constant 1 : index
    %c0_58 = arith.constant 0 : index
    %c0_59 = arith.constant 0 : index
    %56 = vector.load %arg6[%c1_57, %c0_58, %c0_59] : memref<3x64x12xf32, #tpu.memory_space<vmem>>, vector<1x64x12xf32>
    %57 = vector.shape_cast %56 : vector<1x64x12xf32> to vector<64x12xf32>
    %cst_60 = arith.constant dense<0.000000e+00> : vector<64x4xf32>
    %58 = tpu.matmul %57, %54, %cst_60 {dimension_numbers = #tpu.dot_dimension_numbers<[1], [0], [0], [1], [0, 0, 1, 1], [], []>} : vector<64x12xf32>, vector<12x4xf32>, vector<64x4xf32> -> vector<64x4xf32>
    %59 = arith.addf %55, %58 : vector<64x4xf32>
    %c0_61 = arith.constant 0 : index
    %c0_62 = arith.constant 0 : index
    %60 = vector.load %arg7[%c0_61, %c0_62] : memref<64x4xf32, #tpu.memory_space<vmem>>, vector<64x4xf32>
    tpu.vector_store %arg7[%c0_61, %c0_62], %59 {strides = array<i32>} : memref<64x4xf32, #tpu.memory_space<vmem>>, vector<64x4xf32>,
    %c0_63 = arith.constant 0 : index
    %c0_64 = arith.constant 0 : index
    %c1_65 = arith.constant 1 : index
    %c0_66 = arith.constant 0 : index
    %c0_67 = arith.constant 0 : index
    %61 = vector.load %arg3[%c0_63, %c0_64, %c1_65, %c0_66, %c0_67] : memref<1x1x36x9x4xf32, #tpu.memory_space<vmem>>, vector<1x1x8x8x4xf32>
    %62 = vector.shape_cast %61 : vector<1x1x8x8x4xf32> to vector<8x8x4xf32>
    %63 = vector.shape_cast %62 : vector<8x8x4xf32> to vector<64x4xf32>
    %c2 = arith.constant 2 : index
    %c0_68 = arith.constant 0 : index
    %c0_69 = arith.constant 0 : index
    %64 = vector.load %arg6[%c2, %c0_68, %c0_69] : memref<3x64x12xf32, #tpu.memory_space<vmem>>, vector<1x64x4xf32>
    %65 = vector.shape_cast %64 : vector<1x64x4xf32> to vector<64x4xf32>
    %66 = vector.shape_cast %63 : vector<64x4xf32> to vector<1x64x4xf32>
    tpu.vector_store %arg6[%c2, %c0_68, %c0_69], %66 {strides = array<i32>} : memref<3x64x12xf32, #tpu.memory_space<vmem>>, vector<1x64x4xf32>,
    %c0_70 = arith.constant 0 : index
    %c0_71 = arith.constant 0 : index
    %c10 = arith.constant 10 : index
    %c0_72 = arith.constant 0 : index
    %c0_73 = arith.constant 0 : index
    %67 = vector.load %arg3[%c0_70, %c0_71, %c10, %c0_72, %c0_73] : memref<1x1x36x9x4xf32, #tpu.memory_space<vmem>>, vector<1x1x8x8x4xf32>
    %68 = vector.shape_cast %67 : vector<1x1x8x8x4xf32> to vector<8x8x4xf32>
    %69 = vector.shape_cast %68 : vector<8x8x4xf32> to vector<64x4xf32>
    %c2_74 = arith.constant 2 : index
    %c0_75 = arith.constant 0 : index
    %c4_76 = arith.constant 4 : index
    %70 = vector.load %arg6[%c2_74, %c0_75, %c4_76] : memref<3x64x12xf32, #tpu.memory_space<vmem>>, vector<1x64x4xf32>
    %71 = vector.shape_cast %70 : vector<1x64x4xf32> to vector<64x4xf32>
    %72 = vector.shape_cast %69 : vector<64x4xf32> to vector<1x64x4xf32>
    tpu.vector_store %arg6[%c2_74, %c0_75, %c4_76], %72 {strides = array<i32>} : memref<3x64x12xf32, #tpu.memory_space<vmem>>, vector<1x64x4xf32>,
    %c0_77 = arith.constant 0 : index
    %c0_78 = arith.constant 0 : index
    %c1_79 = arith.constant 1 : index
    %c1_80 = arith.constant 1 : index
    %c0_81 = arith.constant 0 : index
    %73 = vector.load %arg3[%c0_77, %c0_78, %c1_79, %c1_80, %c0_81] : memref<1x1x36x9x4xf32, #tpu.memory_space<vmem>>, vector<1x1x8x8x4xf32>
    %74 = vector.shape_cast %73 : vector<1x1x8x8x4xf32> to vector<8x8x4xf32>
    %75 = vector.shape_cast %74 : vector<8x8x4xf32> to vector<64x4xf32>
    %c2_82 = arith.constant 2 : index
    %c0_83 = arith.constant 0 : index
    %c8_84 = arith.constant 8 : index
    %76 = vector.load %arg6[%c2_82, %c0_83, %c8_84] : memref<3x64x12xf32, #tpu.memory_space<vmem>>, vector<1x64x4xf32>
    %77 = vector.shape_cast %76 : vector<1x64x4xf32> to vector<64x4xf32>
    %78 = vector.shape_cast %75 : vector<64x4xf32> to vector<1x64x4xf32>
    tpu.vector_store %arg6[%c2_82, %c0_83, %c8_84], %78 {strides = array<i32>} : memref<3x64x12xf32, #tpu.memory_space<vmem>>, vector<1x64x4xf32>,
    %c3_i32_85 = arith.constant 3 : i32
    %79 = arith.muli %arg2, %c3_i32_85 : i32
    %c2_i32 = arith.constant 2 : i32
    %80 = arith.addi %79, %c2_i32 : i32
    %81 = arith.index_cast %80 : i32 to index
    %c0_86 = arith.constant 0 : index
    %c0_87 = arith.constant 0 : index
    %82 = vector.load %arg4[%81, %c0_86, %c0_87] : memref<9x12x4xf32, #tpu.memory_space<vmem>>, vector<1x12x4xf32>
    %83 = vector.shape_cast %82 : vector<1x12x4xf32> to vector<12x4xf32>
    %c0_88 = arith.constant 0 : index
    %c0_89 = arith.constant 0 : index
    %84 = vector.load %arg7[%c0_88, %c0_89] : memref<64x4xf32, #tpu.memory_space<vmem>>, vector<64x4xf32>
    %c2_90 = arith.constant 2 : index
    %c0_91 = arith.constant 0 : index
    %c0_92 = arith.constant 0 : index
    %85 = vector.load %arg6[%c2_90, %c0_91, %c0_92] : memref<3x64x12xf32, #tpu.memory_space<vmem>>, vector<1x64x12xf32>
    %86 = vector.shape_cast %85 : vector<1x64x12xf32> to vector<64x12xf32>
    %cst_93 = arith.constant dense<0.000000e+00> : vector<64x4xf32>
    %87 = tpu.matmul %86, %83, %cst_93 {dimension_numbers = #tpu.dot_dimension_numbers<[1], [0], [0], [1], [0, 0, 1, 1], [], []>} : vector<64x12xf32>, vector<12x4xf32>, vector<64x4xf32> -> vector<64x4xf32>
    %88 = arith.addf %84, %87 : vector<64x4xf32>
    %c0_94 = arith.constant 0 : index
    %c0_95 = arith.constant 0 : index
    %89 = vector.load %arg7[%c0_94, %c0_95] : memref<64x4xf32, #tpu.memory_space<vmem>>, vector<64x4xf32>
    tpu.vector_store %arg7[%c0_94, %c0_95], %88 {strides = array<i32>} : memref<64x4xf32, #tpu.memory_space<vmem>>, vector<64x4xf32>,
    %c2_i32_96 = arith.constant 2 : i32
    %90 = arith.cmpi eq, %arg2, %c2_i32_96 : i32
    %91 = arith.extui %90 : i1 to i32
    %c0_i32_97 = arith.constant 0 : i32
    %92 = arith.cmpi ne, %91, %c0_i32_97 : i32
    scf.if %92 {
      %c0_98 = arith.constant 0 : index
      %c0_99 = arith.constant 0 : index
      %93 = vector.load %arg7[%c0_98, %c0_99] : memref<64x4xf32, #tpu.memory_space<vmem>>, vector<64x4xf32>
      %c0_100 = arith.constant 0 : index
      %c0_101 = arith.constant 0 : index
      %c0_102 = arith.constant 0 : index
      %c0_103 = arith.constant 0 : index
      %94 = vector.load %arg5[%c0_100, %c0_101, %c0_102, %c0_103] : memref<1x1x64x4xf32, #tpu.memory_space<vmem>>, vector<1x1x64x4xf32>
      %95 = vector.shape_cast %94 : vector<1x1x64x4xf32> to vector<64x4xf32>
      %96 = vector.shape_cast %93 : vector<64x4xf32> to vector<1x1x64x4xf32>
      tpu.vector_store %arg5[%c0_100, %c0_101, %c0_102, %c0_103], %96 {strides = array<i32>} : memref<1x1x64x4xf32, #tpu.memory_space<vmem>>, vector<1x1x64x4xf32>,
    } else {
    }
    return
  }
  func.func @transform_0(%arg0: i32, %arg1: i32, %arg2: i32) -> (i32, i32, i32, i32, i32) {
    %c2_i32 = arith.constant 2 : i32
    %0 = arith.muli %c2_i32, %arg1 : i32
    %1 = arith.addi %0, %arg2 : i32
    %c0_i32 = arith.constant 0 : i32
    %c0_i32_0 = arith.constant 0 : i32
    %c0_i32_1 = arith.constant 0 : i32
    %c0_i32_2 = arith.constant 0 : i32
    return %arg0, %1, %c0_i32, %c0_i32_0, %c0_i32_1 : i32, i32, i32, i32, i32
  }
  func.func @transform_1(%arg0: i32, %arg1: i32, %arg2: i32) -> (i32, i32, i32) {
    %c0_i32 = arith.constant 0 : i32
    %c0_i32_0 = arith.constant 0 : i32
    %c0_i32_1 = arith.constant 0 : i32
    %c0_i32_2 = arith.constant 0 : i32
    return %c0_i32, %c0_i32_0, %c0_i32_1 : i32, i32, i32
  }
  func.func @transform_2(%arg0: i32, %arg1: i32, %arg2: i32) -> (i32, i32, i32, i32) {
    %c0_i32 = arith.constant 0 : i32
    %c0_i32_0 = arith.constant 0 : i32
    %c0_i32_1 = arith.constant 0 : i32
    return %arg0, %arg1, %c0_i32, %c0_i32_0 : i32, i32, i32, i32
  }
}

</mosaic_0001>

<bundles_post_ra>
// kernel: tpu_custom_call.1
= control target key start
LH: loop header
LB: loop body
LE: loop exit
PB: predicated region body
PF: predicated region fallthrough
CT: control target
= control target key end

     0   :  { %s1541_s9 = smov 0   ;;  %s1543_s10 = smov 0   ;;  %s1939_s0 = inlined_call_operand.vmem [shape: f32[2,18,36,9,4], index: 0, kind: input, shape index: {}]   ;;  %s1940_s1 = inlined_call_operand.vmem [shape: f32[9,12,4], index: 1, kind: input, shape index: {}]   ;;  %s1941_s2 = inlined_call_operand.vmem [shape: f32[2,8,64,4], index: 2, kind: output, shape index: {}]  }
   0x1   :  { %s1545_s11 = smov 0   ;;  %s1547_s12 = smov 0  }
   0x2   :  { %s1549_s13 = smov 0   ;;  %s1551_s14 = smov 0  }
   0x3   :  { %s1553_s15 = smov 0  }
   0x4 LB: > { %s24_s16 = sadd.s32 1, %s1508_s12  ;;  %s27_s17 = sadd.s32 1, %s1512_s13  ;;  %s1520_s15 = sphi %s1553_s15, %s12_s15   ;;  %s1516_s14 = sphi %s1551_s14, %s1949_s14   ;;  %s1512_s13 = sphi %s1549_s13, %s1948_s13   ;;  %s1508_s12 = sphi %s1547_s12, %s1947_s12   ;;  %s1504_s11 = sphi %s1545_s11, %s1946_s11   ;;  %s1500_s10 = sphi %s1543_s10, %s1945_s10   ;;  %s1496_s9 = sphi %s1541_s9, %s1944_s9  }
   0x5   : > { %p25_p0 = scmp.ge.s32.totalorder %s24_s16, 3  ;;  %p1206_p1 = scmp.ge.s32.totalorder %s1520_s15, 1 }
   0x6   : > { %p147_p2 = scmp.lt.s32.totalorder %s1520_s15, 49  ;;  %s31_s18 = sadd.s32 1, %s1516_s14 }
   0x7   : > { %s1951_s16 = smov (%p25_p0, %s24_s16), 0  ;;  %s1953_s17 = smov (!%p25_p0, %s27_s17), %s1512_s13 }
   0x8   : > { %p148_p3 = pnand %p1206_p1, %p147_p2  ;;  %p29_p4 = scmp.ge.s32.totalorder %s1953_s17, 8 }
   0x9   : > { %s1207_s19 = sshll.u32 (!%p148_p3), %s1500_s10, 1  ;;  %p181_p6 = scmp.lt.s32.totalorder (!%p148_p3), %s1504_s11, 1 }
   0xa   : > { %s1955_s17 = smov (%p29_p4, %s1953_s17), 0  ;;  %s1957_s18 = smov (!%p29_p4, %s31_s18), %s1516_s14 }
   0xb   : > { %p33_p5 = scmp.ge.s32.totalorder %s1957_s18, 2  ;;  %151 = sbr.rel (%p148_p3) target bundleno = 469 (0x1d5), region = 28 }
   0xc   : > { %s180_s20 = sadd.s32 (!%p148_p3), %s1496_s9, %s1207_s19  ;;  %p194_p7 = scmp.lt.s32.totalorder (!%p148_p3), %s1500_s10, 7 }
   0xd   : > { %s1959_s18 = smov (%p33_p5, %s1957_s18), 0  ;;  %p183_p8 = scmp.lt.s32.totalorder (!%p148_p3), %s180_s20, 17 }
   0xe   : > { %p1212_p9 = scmp.ne.s32.totalorder (!%p148_p3), %s1496_s9, 0 }
  0x12   : > { %s1961_s11 = smov (!%p181_p6, %s1504_s11), 1  ;;  %s1963_s20 = smov (!%p183_p8, %s180_s20), 17 }
  0x13   : > { %s1405_s21 = smul.u32 1296, %s1961_s11  ;;  %s1210_s22 = sshll.u32 %s1961_s11, 6  ;;  %vm205_vm0 = vcmask (!%p1212_p9), 31744   ;;  %v1522_v0 = vmov (!%p1212_p9), 0.0  }
  0x14   : > { %s1965_s10 = smov (!%p194_p7, %s1500_s10), 7  ;;  %s1404_s23 = smul.u32 72, %s1963_s20  ;;  %206 = vst.msk [vmem:[#allocation3] sm:$0xff] (!%p1212_p9), %vm205_vm0, %v1522_v0  ;;  %207 = vst.msk [vmem:[#allocation3 + $0x8] sm:$0xff] (!%p1212_p9), %vm205_vm0, %v1522_v0 }
  0x15   : > { %s1209_s24 = sshll.u32 %s1965_s10, 3  ;;  %204 = sbr.rel (%p1212_p9) target bundleno = 28 (0x1c), region = 32  ;;  %208 = vst.msk [vmem:[#allocation3 + $0x10] sm:$0xff] (!%p1212_p9), %vm205_vm0, %v1522_v0  ;;  %209 = vst.msk [vmem:[#allocation3 + $0x18] sm:$0xff] (!%p1212_p9), %vm205_vm0, %v1522_v0 }
  0x16   : > { %s187_s25 = sadd.s32 %s1405_s21, %s1404_s23  ;;  %s198_s26 = sadd.s32 %s1210_s22, %s1209_s24  ;;  %210 = vst.msk [vmem:[#allocation3 + $0x20] sm:$0xff] (!%p1212_p9), %vm205_vm0, %v1522_v0  ;;  %211 = vst.msk [vmem:[#allocation3 + $0x28] sm:$0xff] (!%p1212_p9), %vm205_vm0, %v1522_v0 }
  0x17   : > { %s1208_s27 = sshll.u32 %s187_s25, 3  ;;  %s1211_s28 = sshll.u32 %s198_s26, 3  ;;  %212 = vst.msk [vmem:[#allocation3 + $0x30] sm:$0xff] (!%p1212_p9), %vm205_vm0, %v1522_v0  ;;  %213 = vst.msk [vmem:[#allocation3 + $0x38] sm:$0xff] (!%p1212_p9), %vm205_vm0, %v1522_v0 }
  0x18   : > { %s1594_s3 = scalar_lea.vmem %s1939_s0, %s1208_s27  ;;  %s1599_s6 = scalar_lea.vmem %s1941_s2, %s1211_s28 }
  0x1c PF: > { %v1603_v1 = vld [vmem:[%s1594_s3 + $0xd0] sm:$0xff]  ;;  %v1606_v2 = vld [vmem:[%s1594_s3 + $0x41] sm:$0xff]  ;;  %s1523_s7 = smov 4   ;;  %s1524_s8 = smov 8   ;;  %vm222_vm1 = vcmask 31744   ;;  %vm376_vm2 = vcmask 1043456  }
  0x1d   : > { %256 = vrot.lane.b32.xlu0 %v1603_v1, %s1523_s7  ;;  %305 = vrot.lane.b32.xlu1 %v1606_v2, %s1524_s8  ;;  %v1613_v3 = vld [vmem:[%s1594_s3 + $0xe0] sm:$0xff]  ;;  %v1616_v4 = vld [vmem:[%s1594_s3 + $0x51] sm:$0xff]  ;;  %s1221_s10 = smul.u32 48, %s1496_s9  ;;  %vm1525_vm3 = vmmov 1   ;;  %vm272_vm5 = vcmask 64544   ;;  %vm321_vm6 = vcmask 97344  }
  0x1e   : > { %v1623_v5 = vld [vmem:[%s1594_s3 + $0xf0] sm:$0xff]  ;;  %v1626_v6 = vld [vmem:[%s1594_s3 + $0x100] sm:$0xff]  ;;  %vm1657_vm4 = vmpackc.low %vm376_vm2, %vm1525_vm3  ;;  %vm351_vm7 = vcmask 97280   ;;  %p1303_p10 = scmp.ne.s32.totalorder %s1496_s9, 2 }
  0x1f   : > { %v1634_v7 = vld [vmem:[%s1594_s3 + $0x61] sm:$0xff]  ;;  %v1213_v8 = vld [vmem:[%s1594_s3 + $0x90] sm:$0xff]  ;;  %s1640_s20 = scalar_lea.vmem %s1940_s1, %s1221_s10 }
  0x20   : > { %v1643_v9 = vld [vmem:[%s1594_s3 + $0x71] sm:$0xff]  ;;  %v1646_v10 = vld [vmem:[%s1594_s3 + $0xa0] sm:$0xff]  ;;  %v334_v17 = vld [vmem:[%s1640_s20 + $0x8] sm:$0xf] }
  0x21   : > { %258 = vrot.lane.b32.xlu0 %v1613_v3, %s1523_s7  ;;  %307 = vrot.lane.b32.xlu1 %v1616_v4, %s1524_s8  ;;  %v218_v11 = vld [vmem:[%s1594_s3 + $0x40] sm:$0xff]  ;;  %v219_v12 = vld [vmem:[%s1594_s3 + $0x50] sm:$0xff] }
  0x22   : > { %227 = vst.msk [vmem:[#allocation2 + $0x20] sm:$0xff] %vm222_vm1, %v218_v11  ;;  %228 = vst.msk [vmem:[#allocation2 + $0x28] sm:$0xff] %vm222_vm1, %v219_v12  ;;  %v220_v13 = vld [vmem:[%s1594_s3 + $0x60] sm:$0xff]  ;;  %v221_v14 = vld [vmem:[%s1594_s3 + $0x70] sm:$0xff] }
  0x23   : > { %798 = vst.msk [vmem:[#allocation2 + $0x98] sm:$0xff] %vm222_vm1, %v218_v11  ;;  %799 = vst.msk [vmem:[#allocation2 + $0xa0] sm:$0xff] %vm222_vm1, %v219_v12  ;;  %v333_v16 = vld [vmem:[%s1640_s20] sm:$0xff]  ;;  %v215_v20 = vld [vmem:[%s1594_s3 + $0x10] sm:$0xff] }
  0x24   : > { %229 = vst.msk [vmem:[#allocation2 + $0x30] sm:$0xff] %vm222_vm1, %v220_v13  ;;  %230 = vst.msk [vmem:[#allocation2 + $0x38] sm:$0xff] %vm222_vm1, %v221_v14  ;;  %v214_v18 = vld [vmem:[%s1594_s3] sm:$0xff]  ;;  %v1384_v19 = vpack.c.bf16 %v334_v17, %v333_v16  ;;  %v1232_v22 = vld [vmem:[%s1594_s3 + $0x130] sm:$0xff] }
  0x25   : > { %260 = vrot.lane.b32.xlu0 %v1623_v5, %s1523_s7  ;;  %262 = vrot.lane.b32.xlu1 %v1626_v6, %s1523_s7  ;;  %800 = vst.msk [vmem:[#allocation2 + $0xa8] sm:$0xff] %vm222_vm1, %v220_v13  ;;  %801 = vst.msk [vmem:[#allocation2 + $0xb0] sm:$0xff] %vm222_vm1, %v221_v14  ;;  %v1231_v21 = vld [vmem:[%s1594_s3 + $0x120] sm:$0xff]  ;;  %v1687_v25 = vld [vmem:[%s1594_s3 + $0x11] sm:$0xff] }
  0x26   : > { %223 = vst.msk [vmem:[#allocation2] sm:$0xff] %vm222_vm1, %v214_v18  ;;  %224 = vst.msk [vmem:[#allocation2 + $0x8] sm:$0xff] %vm222_vm1, %v215_v20  ;;  %v216_v23 = vld [vmem:[%s1594_s3 + $0x20] sm:$0xff]  ;;  %1402 = vmatprep.subr.msk.bf16.mxu1 %vm1657_vm4, %v1384_v19  ;;  %1386 = vmatprep.subr.msk.bf16.mxu0 %vm1657_vm4, %v1384_v19  ;;  %v217_v26 = vld [vmem:[%s1594_s3 + $0x30] sm:$0xff] }
  0x27   : > { %511 = vst.msk [vmem:[#allocation2 + $0x40] sm:$0xff] %vm222_vm1, %v1231_v21  ;;  %512 = vst.msk [vmem:[#allocation2 + $0x48] sm:$0xff] %vm222_vm1, %v1232_v22  ;;  %v281_v24 = vld [vmem:[%s1594_s3 + $0x1] sm:$0xff]  ;;  %1403 = vmatpush3.bf16.msk.msra.mxu1 %vm1657_vm4, %v1384_v19  ;;  %1389 = vmatpush3.bf16.msk.msra.mxu0 %vm1657_vm4, %v1384_v19  ;;  %v1256_v27 = vld [vmem:[%s1640_s20 + $0x10] sm:$0xff] }
  0x28   : > { %795 = vst.msk [vmem:[#allocation2 + $0x80] sm:$0xff] %vm222_vm1, %v215_v20  ;;  %225 = vst.msk [vmem:[#allocation2 + $0x10] sm:$0xff] %vm222_vm1, %v216_v23  ;;  %v1257_v28 = vld [vmem:[%s1640_s20 + $0x18] sm:$0xf]  ;;  %v1239_v29 = vld [vmem:[%s1594_s3 + $0x1b0] sm:$0xff] }
  0x29   : > { %309 = vrot.lane.b32.xlu0 %v1634_v7, %s1524_s8  ;;  %248 = vrot.lane.b32.xlu1 %v1213_v8, %s1523_s7  ;;  %796 = vst.msk [vmem:[#allocation2 + $0x88] sm:$0xff] %vm222_vm1, %v216_v23  ;;  %226 = vst.msk [vmem:[#allocation2 + $0x18] sm:$0xff] %vm222_vm1, %v217_v26  ;;  %v1240_v30 = vld [vmem:[%s1594_s3 + $0x1c0] sm:$0xff]  ;;  %v1707_v31 = vpack.c.bf16 %v1257_v28, %v1256_v27  ;;  %v1215_v34 = vld [vmem:[%s1594_s3 + $0xb0] sm:$0xff] }
  0x2a   : > { %797 = vst.msk [vmem:[#allocation2 + $0x90] sm:$0xff] %vm222_vm1, %v217_v26  ;;  %v1233_v32 = vld [vmem:[%s1594_s3 + $0x140] sm:$0xff]  ;;  %v1234_v35 = vld [vmem:[%s1594_s3 + $0x150] sm:$0xff]  ;;  %v1293_v53 = vld [vmem:[%s1640_s20 + $0x28] sm:$0xf] }
  0x2b   : > { %1392 = vmatprep.subr.msk.bf16.mxu1 %vm1657_vm4, %v1707_v31  ;;  %513 = vst.msk [vmem:[#allocation2 + $0x50] sm:$0xff] %vm222_vm1, %v1233_v32  ;;  %v1247_v33 = vld [vmem:[%s1594_s3 + $0x121] sm:$0xff]  ;;  %514 = vst.msk [vmem:[#allocation2 + $0x58] sm:$0xff] %vm222_vm1, %v1234_v35  ;;  %v1248_v36 = vld [vmem:[%s1594_s3 + $0x131] sm:$0xff] }
  0x2c   : > { %v1216_v37 = vld [vmem:[%s1594_s3 + $0xc0] sm:$0xff]  ;;  %v284_v40 = vld [vmem:[%s1594_s3 + $0x31] sm:$0xff] }
  0x2d   : > { %311 = vrot.lane.b32.xlu0 %v1643_v9, %s1524_s8  ;;  %250 = vrot.lane.b32.xlu1 %v1646_v10, %s1523_s7  ;;  %v1235_v38 = vld [vmem:[%s1594_s3 + $0x160] sm:$0xff]  ;;  %v1236_v41 = vld [vmem:[%s1594_s3 + $0x170] sm:$0xff] }
  0x2e   : > { %v283_v39 = vld [vmem:[%s1594_s3 + $0x21] sm:$0xff]  ;;  %515 = vst.msk [vmem:[#allocation2 + $0x60] sm:$0xff] %vm222_vm1, %v1235_v38  ;;  %516 = vst.msk [vmem:[#allocation2 + $0x68] sm:$0xff] %vm222_vm1, %v1236_v41  ;;  %v1241_v42 = vld [vmem:[%s1594_s3 + $0x1d0] sm:$0xff] }
  0x2f   : > { %v1242_v43 = vld [vmem:[%s1594_s3 + $0x1e0] sm:$0xff]  ;;  %v1250_v45 = vld [vmem:[%s1594_s3 + $0x151] sm:$0xff] }
  0x30   : > { %v1249_v44 = vld [vmem:[%s1594_s3 + $0x141] sm:$0xff]  ;;  %v1243_v46 = vld [vmem:[%s1594_s3 + $0x1f0] sm:$0xff] }
  0x31   : > { %297 = vrot.lane.b32.xlu0 %v281_v24, %s1524_s8  ;;  %299 = vrot.lane.b32.xlu1 %v1687_v25, %s1524_s8  ;;  %v1244_v47 = vld [vmem:[%s1594_s3 + $0x200] sm:$0xff]  ;;  %v1252_v50 = vld [vmem:[%s1594_s3 + $0x171] sm:$0xff] }
  0x32   : > { %v1237_v48 = vld [vmem:[%s1594_s3 + $0x180] sm:$0xff]  ;;  %v1238_v51 = vld [vmem:[%s1594_s3 + $0x190] sm:$0xff] }
  0x33   : > { %517 = vst.msk [vmem:[#allocation2 + $0x70] sm:$0xff] %vm222_vm1, %v1237_v48  ;;  %v1251_v49 = vld [vmem:[%s1594_s3 + $0x161] sm:$0xff]  ;;  %518 = vst.msk [vmem:[#allocation2 + $0x78] sm:$0xff] %vm222_vm1, %v1238_v51  ;;  %v1245_v55 = vld [vmem:[%s1594_s3 + $0x210] sm:$0xff] }
  0x34   : > { %v1292_v52 = vld [vmem:[%s1640_s20 + $0x20] sm:$0xff]  ;;  %v1254_v58 = vld [vmem:[%s1594_s3 + $0x191] sm:$0xff] }
  0x35   : > { %536 = vrot.lane.b32.xlu0 %v1239_v29, %s1523_s7  ;;  %538 = vrot.lane.b32.xlu1 %v1240_v30, %s1523_s7  ;;  %v1756_v54 = vpack.c.bf16 %v1293_v53, %v1292_v52  ;;  %v1246_v56 = vld [vmem:[%s1594_s3 + $0x220] sm:$0xff]  ;;  %v1282_v60 = vld [vmem:[%s1594_s3 + $0x110] sm:$0xff] }
  0x36   : > { %v1253_v57 = vld [vmem:[%s1594_s3 + $0x181] sm:$0xff] }
  0x37   : > { %1398 = vmatprep.subr.msk.bf16.mxu0 %vm1657_vm4, %v1756_v54  ;;  %v1274_v59 = vld [vmem:[%s1594_s3 + $0x80] sm:$0xff] }
  0x38   : > { %802 = vst.msk [vmem:[#allocation2 + $0xb8] sm:$0xff] %vm222_vm1, %v1274_v59  ;;  %v1290_v61 = vld [vmem:[%s1594_s3 + $0x81] sm:$0xff] }
  0x39   : > { %584 = vrot.lane.b32.xlu0 %v1247_v33, %s1524_s8  ;;  %252 = vrot.lane.b32.xlu1 %v1215_v34, %s1523_s7 }
  0x3d   : > { %586 = vrot.lane.b32.xlu0 %v1248_v36, %s1524_s8  ;;  %254 = vrot.lane.b32.xlu1 %v1216_v37, %s1523_s7 }
  0x41   : > { %301 = vrot.lane.b32.xlu0 %v283_v39, %s1524_s8  ;;  %303 = vrot.lane.b32.xlu1 %v284_v40, %s1524_s8 }
  0x45   : > { %540 = vrot.lane.b32.xlu0 %v1241_v42, %s1523_s7  ;;  %542 = vrot.lane.b32.xlu1 %v1242_v43, %s1523_s7 }
  0x49   : > { %588 = vrot.lane.b32.xlu0 %v1249_v44, %s1524_s8  ;;  %590 = vrot.lane.b32.xlu1 %v1250_v45, %s1524_s8 }
  0x4d   : > { %544 = vrot.lane.b32.xlu0 %v1243_v46, %s1523_s7  ;;  %546 = vrot.lane.b32.xlu1 %v1244_v47, %s1523_s7 }
  0x51   : > { %592 = vrot.lane.b32.xlu0 %v1251_v49, %s1524_s8  ;;  %594 = vrot.lane.b32.xlu1 %v1252_v50, %s1524_s8 }
  0x55   : > { %820 = vrot.lane.b32.xlu0 %v1646_v10, %s1523_s7  ;;  %822 = vrot.lane.b32.xlu1 %v1215_v34, %s1523_s7 }
  0x59   : > { %868 = vrot.lane.b32.xlu0 %v1687_v25, %s1524_s8  ;;  %548 = vrot.lane.b32.xlu1 %v1245_v55, %s1523_s7 }
  0x5d   : > { %870 = vrot.lane.b32.xlu0 %v283_v39, %s1524_s8  ;;  %550 = vrot.lane.b32.xlu1 %v1246_v56, %s1523_s7 }
  0x61   : > { %596 = vrot.lane.b32.xlu0 %v1253_v57, %s1524_s8  ;;  %598 = vrot.lane.b32.xlu1 %v1254_v58, %s1524_s8 }
  0x65   : > { %824 = vrot.lane.b32.xlu0 %v1216_v37, %s1523_s7  ;;  %826 = vrot.lane.b32.xlu1 %v1603_v1, %s1523_s7 }
  0x69   : > { %872 = vrot.lane.b32.xlu0 %v284_v40, %s1524_s8  ;;  %874 = vrot.lane.b32.xlu1 %v1606_v2, %s1524_s8 }
  0x6d   : > { %828 = vrot.lane.b32.xlu0 %v1613_v3, %s1523_s7  ;;  %830 = vrot.lane.b32.xlu1 %v1623_v5, %s1523_s7 }
  0x71   : > { %876 = vrot.lane.b32.xlu0 %v1616_v4, %s1524_s8  ;;  %878 = vrot.lane.b32.xlu1 %v1634_v7, %s1524_s8 }
  0x75   : > { %832 = vrot.lane.b32.xlu0 %v1626_v6, %s1523_s7  ;;  %834 = vrot.lane.b32.xlu1 %v1282_v60, %s1523_s7 }
  0x79   : > { %880 = vrot.lane.b32.xlu0 %v1643_v9, %s1524_s8  ;;  %882 = vrot.lane.b32.xlu1 %v1290_v61, %s1524_s8 }
  0x8f   : > { %v257_v62 = vpop.permute.xlu0 %256  ;;  %v306_v63 = vpop.permute.xlu1 %305 }
  0x90   : > { %277 = vst.msk [vmem:[#allocation2 + $0x20] sm:$0xff] %vm272_vm5, %v257_v62 }
  0x91   : > { %326 = vst.msk [vmem:[#allocation2 + $0x20] sm:$0xff] %vm321_vm6, %v306_v63 }
  0x93   : > { %v259_v0 = vpop.permute.xlu0 %258  ;;  %v308_v1 = vpop.permute.xlu1 %307 }
  0x94   : > { %278 = vst.msk [vmem:[#allocation2 + $0x28] sm:$0xff] %vm272_vm5, %v259_v0 }
  0x95   : > { %327 = vst.msk [vmem:[#allocation2 + $0x28] sm:$0xff] %vm321_vm6, %v308_v1 }
  0x97   : > { %v261_v2 = vpop.permute.xlu0 %260  ;;  %v263_v3 = vpop.permute.xlu1 %262 }
  0x98   : > { %279 = vst.msk [vmem:[#allocation2 + $0x30] sm:$0xff] %vm272_vm5, %v261_v2  ;;  %280 = vst.msk [vmem:[#allocation2 + $0x38] sm:$0xff] %vm272_vm5, %v263_v3  ;;  %v347_v4 = vld [vmem:[#allocation2 + $0x20] sm:$0xff] }
  0x99   : > { %1346 = vmatprep.mubr.msk.f32.mxu1 %vm351_vm7, %v347_v4 }
  0x9b   : > { %v310_v5 = vpop.permute.xlu0 %309  ;;  %v249_v6 = vpop.permute.xlu1 %248 }
  0x9c   : > { %328 = vst.msk [vmem:[#allocation2 + $0x30] sm:$0xff] %vm321_vm6, %v310_v5  ;;  %v348_v7 = vld [vmem:[#allocation2 + $0x28] sm:$0xff] }
  0x9d   : > { %273 = vst.msk [vmem:[#allocation2] sm:$0xff] %vm272_vm5, %v249_v6  ;;  %1347 = vmatmul.mubr.msk.f32.vlgmr.msra.gmra.mrb[0].mxu1 %vm351_vm7, %v348_v7  ;;  %v340_v6 = vld [vmem:[#allocation3 + $0x28] sm:$0xff]  ;;  %v339_v7 = vld [vmem:[#allocation3 + $0x20] sm:$0xff] }
  0x9e   : > { %1395 = vmatpush3.bf16.msk.msra.mxu1 %vm1657_vm4, %v1707_v31 }
  0x9f   : > { %v312_v8 = vpop.permute.xlu0 %311  ;;  %v251_v9 = vpop.permute.xlu1 %250 }
  0xa0   : > { %329 = vst.msk [vmem:[#allocation2 + $0x38] sm:$0xff] %vm321_vm6, %v312_v8 }
  0xa1   : > { %274 = vst.msk [vmem:[#allocation2 + $0x8] sm:$0xff] %vm272_vm5, %v251_v9 }
  0xa3   : > { %v298_v10 = vpop.permute.xlu0 %297  ;;  %v300_v11 = vpop.permute.xlu1 %299  ;;  %v349_v12 = vld [vmem:[#allocation2 + $0x30] sm:$0xff] }
  0xa4   : > { %322 = vst.msk [vmem:[#allocation2] sm:$0xff] %vm321_vm6, %v298_v10  ;;  %323 = vst.msk [vmem:[#allocation2 + $0x8] sm:$0xff] %vm321_vm6, %v300_v11  ;;  %1349 = vmatprep.mubr.msk.f32.mxu1 %vm351_vm7, %v349_v12  ;;  %v342_v12 = vld [vmem:[#allocation3 + $0x38] sm:$0xff] }
  0xa7   : > { %v537_v13 = vpop.permute.xlu0 %536  ;;  %v539_v14 = vpop.permute.xlu1 %538  ;;  %v350_v16 = vld [vmem:[#allocation2 + $0x38] sm:$0xff] }
  0xa8   : > { %560 = vst.msk [vmem:[#allocation2 + $0x40] sm:$0xff] %vm272_vm5, %v537_v13  ;;  %561 = vst.msk [vmem:[#allocation2 + $0x48] sm:$0xff] %vm272_vm5, %v539_v14  ;;  %1350 = vmatmul.mubr.msk.f32.gmra.mrb[2].mxu1 %vm351_vm7, %v350_v16  ;;  %v341_v13 = vld [vmem:[#allocation3 + $0x30] sm:$0xff] }
  0xab   : > { %v585_v17 = vpop.permute.xlu0 %584  ;;  %v253_v18 = vpop.permute.xlu1 %252  ;;  %v343_v19 = vld [vmem:[#allocation2] sm:$0xff]  ;;  %v344_v20 = vld [vmem:[#allocation2 + $0x8] sm:$0xff] }
  0xac   : > { %608 = vst.msk [vmem:[#allocation2 + $0x40] sm:$0xff] %vm321_vm6, %v585_v17  ;;  %1340 = vmatprep.mubr.msk.f32.mxu0 %vm351_vm7, %v343_v19  ;;  %v336_v19 = vld [vmem:[#allocation3 + $0x8] sm:$0xff] }
  0xad   : > { %275 = vst.msk [vmem:[#allocation2 + $0x10] sm:$0xff] %vm272_vm5, %v253_v18  ;;  %1341 = vmatmul.mubr.msk.f32.vlgmr.msra.gmra.mrb[0].mxu0 %vm351_vm7, %v344_v20  ;;  %v335_v20 = vld [vmem:[#allocation3] sm:$0xff] }
  0xae   : > { %1401 = vmatpush3.bf16.msk.msra.mxu0 %vm1657_vm4, %v1756_v54 }
  0xaf   : > { %v587_v21 = vpop.permute.xlu0 %586  ;;  %v255_v22 = vpop.permute.xlu1 %254 }
  0xb0   : > { %609 = vst.msk [vmem:[#allocation2 + $0x48] sm:$0xff] %vm321_vm6, %v587_v21 }
  0xb1   : > { %276 = vst.msk [vmem:[#allocation2 + $0x18] sm:$0xff] %vm272_vm5, %v255_v22 }
  0xb3   : > { %v302_v23 = vpop.permute.xlu0 %301  ;;  %v304_v24 = vpop.permute.xlu1 %303  ;;  %v629_v25 = vld [vmem:[#allocation2 + $0x40] sm:$0xff] }
  0xb4   : > { %324 = vst.msk [vmem:[#allocation2 + $0x10] sm:$0xff] %vm321_vm6, %v302_v23  ;;  %325 = vst.msk [vmem:[#allocation2 + $0x18] sm:$0xff] %vm321_vm6, %v304_v24  ;;  %1356 = vmatprep.mubr.msk.f32.mxu1 %vm351_vm7, %v629_v25 }
  0xb7   : > { %v541_v26 = vpop.permute.xlu0 %540  ;;  %v543_v27 = vpop.permute.xlu1 %542  ;;  %v630_v28 = vld [vmem:[#allocation2 + $0x48] sm:$0xff] }
  0xb8   : > { %562 = vst.msk [vmem:[#allocation2 + $0x50] sm:$0xff] %vm272_vm5, %v541_v26  ;;  %563 = vst.msk [vmem:[#allocation2 + $0x58] sm:$0xff] %vm272_vm5, %v543_v27  ;;  %1357 = vmatmul.mubr.msk.f32.vlgmr.msra.gmra.mrb[4].mxu1 %vm351_vm7, %v630_v28 }
  0xbb   : > { %v589_v15 = vpop.permute.xlu0 %588  ;;  %v591_v29 = vpop.permute.xlu1 %590  ;;  %v345_v30 = vld [vmem:[#allocation2 + $0x10] sm:$0xff]  ;;  %v346_v31 = vld [vmem:[#allocation2 + $0x18] sm:$0xff] }
  0xbc   : > { %610 = vst.msk [vmem:[#allocation2 + $0x50] sm:$0xff] %vm321_vm6, %v589_v15  ;;  %611 = vst.msk [vmem:[#allocation2 + $0x58] sm:$0xff] %vm321_vm6, %v591_v29  ;;  %1343 = vmatprep.mubr.msk.f32.mxu0 %vm351_vm7, %v345_v30  ;;  %v338_v30 = vld [vmem:[#allocation3 + $0x18] sm:$0xff] }
  0xbd   : > { %1344 = vmatmul.mubr.msk.f32.gmra.mrb[2].mxu0 %vm351_vm7, %v346_v31  ;;  %v337_v31 = vld [vmem:[#allocation3 + $0x10] sm:$0xff] }
  0xbf   : > { %v545_v32 = vpop.permute.xlu0 %544  ;;  %v547_v33 = vpop.permute.xlu1 %546 }
  0xc0   : > { %564 = vst.msk [vmem:[#allocation2 + $0x60] sm:$0xff] %vm272_vm5, %v545_v32  ;;  %565 = vst.msk [vmem:[#allocation2 + $0x68] sm:$0xff] %vm272_vm5, %v547_v33 }
  0xc3   : > { %v593_v34 = vpop.permute.xlu0 %592  ;;  %v595_v35 = vpop.permute.xlu1 %594  ;;  %v631_v36 = vld [vmem:[#allocation2 + $0x50] sm:$0xff]  ;;  %v632_v37 = vld [vmem:[#allocation2 + $0x58] sm:$0xff] }
  0xc4   : > { %612 = vst.msk [vmem:[#allocation2 + $0x60] sm:$0xff] %vm321_vm6, %v593_v34  ;;  %613 = vst.msk [vmem:[#allocation2 + $0x68] sm:$0xff] %vm321_vm6, %v595_v35  ;;  %1359 = vmatprep.mubr.msk.f32.mxu1 %vm351_vm7, %v631_v36 }
  0xc5   : > { %1360 = vmatmul.mubr.msk.f32.gmra.mrb[6].mxu1 %vm351_vm7, %v632_v37 }
  0xc7   : > { %v821_v38 = vpop.permute.xlu0 %820  ;;  %v823_v39 = vpop.permute.xlu1 %822 }
  0xc8   : > { %844 = vst.msk [vmem:[#allocation2 + $0x80] sm:$0xff] %vm272_vm5, %v821_v38  ;;  %845 = vst.msk [vmem:[#allocation2 + $0x88] sm:$0xff] %vm272_vm5, %v823_v39 }
  0xcb   : > { %v869_v40 = vpop.permute.xlu0 %868  ;;  %v549_v41 = vpop.permute.xlu1 %548  ;;  %v633_v42 = vld [vmem:[#allocation2 + $0x60] sm:$0xff]  ;;  %v634_v43 = vld [vmem:[#allocation2 + $0x68] sm:$0xff] }
  0xcc   : > { %892 = vst.msk [vmem:[#allocation2 + $0x80] sm:$0xff] %vm321_vm6, %v869_v40  ;;  %1362 = vmatprep.mubr.msk.f32.mxu1 %vm351_vm7, %v633_v42 }
  0xcd   : > { %566 = vst.msk [vmem:[#allocation2 + $0x70] sm:$0xff] %vm272_vm5, %v549_v41  ;;  %1363 = vmatmul.mubr.msk.f32.gmra.mrb[8].mxu1 %vm351_vm7, %v634_v43 }
  0xcf   : > { %v871_v44 = vpop.permute.xlu0 %870  ;;  %v551_v45 = vpop.permute.xlu1 %550 }
  0xd0   : > { %893 = vst.msk [vmem:[#allocation2 + $0x88] sm:$0xff] %vm321_vm6, %v871_v44 }
  0xd1   : > { %567 = vst.msk [vmem:[#allocation2 + $0x78] sm:$0xff] %vm272_vm5, %v551_v45 }
  0xd3   : > { %v597_v46 = vpop.permute.xlu0 %596  ;;  %v599_v47 = vpop.permute.xlu1 %598  ;;  %v913_v48 = vld [vmem:[#allocation2 + $0x80] sm:$0xff] }
  0xd4   : > { %614 = vst.msk [vmem:[#allocation2 + $0x70] sm:$0xff] %vm321_vm6, %v597_v46  ;;  %615 = vst.msk [vmem:[#allocation2 + $0x78] sm:$0xff] %vm321_vm6, %v599_v47  ;;  %1372 = vmatprep.mubr.msk.f32.mxu0 %vm351_vm7, %v913_v48 }
  0xd7   : > { %v825_v49 = vpop.permute.xlu0 %824  ;;  %v827_v50 = vpop.permute.xlu1 %826  ;;  %v914_v51 = vld [vmem:[#allocation2 + $0x88] sm:$0xff] }
  0xd8   : > { %846 = vst.msk [vmem:[#allocation2 + $0x90] sm:$0xff] %vm272_vm5, %v825_v49  ;;  %847 = vst.msk [vmem:[#allocation2 + $0x98] sm:$0xff] %vm272_vm5, %v827_v50  ;;  %1373 = vmatmul.mubr.msk.f32.vlgmr.msra.gmra.mrb[4].mxu0 %vm351_vm7, %v914_v51 }
  0xdb   : > { %v873_v52 = vpop.permute.xlu0 %872  ;;  %v875_v53 = vpop.permute.xlu1 %874  ;;  %v635_v54 = vld [vmem:[#allocation2 + $0x70] sm:$0xff]  ;;  %v636_v55 = vld [vmem:[#allocation2 + $0x78] sm:$0xff] }
  0xdc   : > { %894 = vst.msk [vmem:[#allocation2 + $0x90] sm:$0xff] %vm321_vm6, %v873_v52  ;;  %895 = vst.msk [vmem:[#allocation2 + $0x98] sm:$0xff] %vm321_vm6, %v875_v53  ;;  %1365 = vmatprep.mubr.msk.f32.mxu1 %vm351_vm7, %v635_v54 }
  0xdd   : > { %1366 = vmatmul.mubr.msk.f32.gmra.mrb[10].mxu1 %vm351_vm7, %v636_v55 }
  0xdf   : > { %v829_v56 = vpop.permute.xlu0 %828  ;;  %v831_v57 = vpop.permute.xlu1 %830 }
  0xe0   : > { %848 = vst.msk [vmem:[#allocation2 + $0xa0] sm:$0xff] %vm272_vm5, %v829_v56  ;;  %849 = vst.msk [vmem:[#allocation2 + $0xa8] sm:$0xff] %vm272_vm5, %v831_v57 }
  0xe3   : > { %v877_v58 = vpop.permute.xlu0 %876  ;;  %v879_v59 = vpop.permute.xlu1 %878  ;;  %v915_v60 = vld [vmem:[#allocation2 + $0x90] sm:$0xff]  ;;  %v916_v61 = vld [vmem:[#allocation2 + $0x98] sm:$0xff] }
  0xe4   : > { %896 = vst.msk [vmem:[#allocation2 + $0xa0] sm:$0xff] %vm321_vm6, %v877_v58  ;;  %897 = vst.msk [vmem:[#allocation2 + $0xa8] sm:$0xff] %vm321_vm6, %v879_v59  ;;  %1375 = vmatprep.mubr.msk.f32.mxu0 %vm351_vm7, %v915_v60 }
  0xe5   : > { %1376 = vmatmul.mubr.msk.f32.gmra.mrb[6].mxu0 %vm351_vm7, %v916_v61 }
  0xe7   : > { %v833_v62 = vpop.permute.xlu0 %832  ;;  %v835_v63 = vpop.permute.xlu1 %834 }
  0xe8   : > { %850 = vst.msk [vmem:[#allocation2 + $0xb0] sm:$0xff] %vm272_vm5, %v833_v62  ;;  %851 = vst.msk [vmem:[#allocation2 + $0xb8] sm:$0xff] %vm272_vm5, %v835_v63 }
  0xeb   : > { %v881_v0 = vpop.permute.xlu0 %880  ;;  %v883_v1 = vpop.permute.xlu1 %882  ;;  %v917_v2 = vld [vmem:[#allocation2 + $0xa0] sm:$0xff]  ;;  %v918_v3 = vld [vmem:[#allocation2 + $0xa8] sm:$0xff] }
  0xec   : > { %898 = vst.msk [vmem:[#allocation2 + $0xb0] sm:$0xff] %vm321_vm6, %v881_v0  ;;  %899 = vst.msk [vmem:[#allocation2 + $0xb8] sm:$0xff] %vm321_vm6, %v883_v1  ;;  %1378 = vmatprep.mubr.msk.f32.mxu0 %vm351_vm7, %v917_v2 }
  0xed   : > { %1379 = vmatmul.mubr.msk.f32.gmra.mrb[8].mxu0 %vm351_vm7, %v918_v3 }
  0xf3   : > { %v919_v4 = vld [vmem:[#allocation2 + $0xb0] sm:$0xff]  ;;  %v920_v5 = vld [vmem:[#allocation2 + $0xb8] sm:$0xff] }
  0xf4   : > { %1381 = vmatprep.mubr.msk.f32.mxu0 %vm351_vm7, %v919_v4 }
  0xf5   : > { %1382 = vmatmul.mubr.msk.f32.gmra.mrb[10].mxu0 %vm351_vm7, %v920_v5 }
 0x170   : > { %v1348_v8 = vpop.f32.mrb[0].mxu1 }
 0x171   : > { %v490_v9 = vadd.f32 %v1348_v8, %v340_v6  ;;  %v466_v10 = vpop.f32.mrb[1].mxu1 }
 0x172   : > { %v489_v11 = vadd.f32 %v466_v10, %v339_v7 }
 0x173   : > { %498 = vst.msk [vmem:[#allocation3 + $0x28] sm:$0xff] %vm222_vm1, %v490_v9 }
 0x174   : > { %497 = vst.msk [vmem:[#allocation3 + $0x20] sm:$0xff] %vm222_vm1, %v489_v11 }
 0x17a   : > { %v626_v42 = vld [vmem:[#allocation3 + $0x28] sm:$0xff] }
 0x17b   : > { %v1351_v14 = vpop.f32.mrb[2].mxu1  ;;  %v625_v45 = vld [vmem:[#allocation3 + $0x20] sm:$0xff] }
 0x17c   : > { %v492_v16 = vadd.f32 %v1351_v14, %v342_v12  ;;  %v476_v17 = vpop.f32.mrb[3].mxu1 }
 0x17d   : > { %v491_v18 = vadd.f32 %v476_v17, %v341_v13 }
 0x17e   : > { %500 = vst.msk [vmem:[#allocation3 + $0x38] sm:$0xff] %vm222_vm1, %v492_v16 }
 0x17f   : > { %499 = vst.msk [vmem:[#allocation3 + $0x30] sm:$0xff] %vm222_vm1, %v491_v18 }
 0x180   : > { %v1342_v21 = vpop.f32.mrb[0].mxu0 }
 0x181   : > { %v486_v22 = vadd.f32 %v1342_v21, %v336_v19  ;;  %v446_v23 = vpop.f32.mrb[1].mxu0 }
 0x182   : > { %v485_v24 = vadd.f32 %v446_v23, %v335_v20 }
 0x183   : > { %494 = vst.msk [vmem:[#allocation3 + $0x8] sm:$0xff] %vm222_vm1, %v486_v22 }
 0x184   : > { %493 = vst.msk [vmem:[#allocation3] sm:$0xff] %vm222_vm1, %v485_v24 }
 0x185   : > { %v628_v54 = vld [vmem:[#allocation3 + $0x38] sm:$0xff] }
 0x186   : > { %v627_v57 = vld [vmem:[#allocation3 + $0x30] sm:$0xff] }
 0x18a   : > { %v622_v25 = vld [vmem:[#allocation3 + $0x8] sm:$0xff] }
 0x18b   : > { %v1358_v26 = vpop.f32.mrb[4].mxu1  ;;  %v621_v27 = vld [vmem:[#allocation3] sm:$0xff] }
 0x18c   : > { %v770_v28 = vadd.f32 %v1358_v26, %v622_v25  ;;  %v730_v15 = vpop.f32.mrb[5].mxu1 }
 0x18d   : > { %v769_v29 = vadd.f32 %v730_v15, %v621_v27 }
 0x18e   : > { %778 = vst.msk [vmem:[#allocation3 + $0x8] sm:$0xff] %vm222_vm1, %v770_v28 }
 0x18f   : > { %777 = vst.msk [vmem:[#allocation3] sm:$0xff] %vm222_vm1, %v769_v29 }
 0x190   : > { %v1345_v32 = vpop.f32.mrb[2].mxu0 }
 0x191   : > { %v488_v33 = vadd.f32 %v1345_v32, %v338_v30  ;;  %v456_v34 = vpop.f32.mrb[3].mxu0 }
 0x192   : > { %v487_v35 = vadd.f32 %v456_v34, %v337_v31 }
 0x193   : > { %496 = vst.msk [vmem:[#allocation3 + $0x18] sm:$0xff] %vm222_vm1, %v488_v33 }
 0x194   : > { %495 = vst.msk [vmem:[#allocation3 + $0x10] sm:$0xff] %vm222_vm1, %v487_v35 }
 0x195   : > { %v906_v48 = vld [vmem:[#allocation3 + $0x8] sm:$0xff] }
 0x196   : > { %v905_v51 = vld [vmem:[#allocation3] sm:$0xff] }
 0x198   : > { %v1361_v36 = vpop.f32.mrb[6].mxu1 }
 0x199   : > { %v740_v37 = vpop.f32.mrb[7].mxu1 }
 0x19a   : > { %v624_v38 = vld [vmem:[#allocation3 + $0x18] sm:$0xff] }
 0x19b   : > { %v772_v39 = vadd.f32 %v1361_v36, %v624_v38  ;;  %v623_v40 = vld [vmem:[#allocation3 + $0x10] sm:$0xff] }
 0x19c   : > { %v771_v41 = vadd.f32 %v740_v37, %v623_v40 }
 0x19d   : > { %780 = vst.msk [vmem:[#allocation3 + $0x18] sm:$0xff] %vm222_vm1, %v772_v39 }
 0x19e   : > { %779 = vst.msk [vmem:[#allocation3 + $0x10] sm:$0xff] %vm222_vm1, %v771_v41 }
 0x1a0   : > { %v1364_v43 = vpop.f32.mrb[8].mxu1 }
 0x1a1   : > { %v774_v44 = vadd.f32 %v1364_v43, %v626_v42  ;;  %v750_v46 = vpop.f32.mrb[9].mxu1 }
 0x1a2   : > { %v773_v47 = vadd.f32 %v750_v46, %v625_v45 }
 0x1a3   : > { %782 = vst.msk [vmem:[#allocation3 + $0x28] sm:$0xff] %vm222_vm1, %v774_v44 }
 0x1a4   : > { %781 = vst.msk [vmem:[#allocation3 + $0x20] sm:$0xff] %vm222_vm1, %v773_v47  ;;  %v908_v60 = vld [vmem:[#allocation3 + $0x18] sm:$0xff] }
 0x1a5   : > { %v907_v63 = vld [vmem:[#allocation3 + $0x10] sm:$0xff] }
 0x1aa   : > { %v910_v2 = vld [vmem:[#allocation3 + $0x28] sm:$0xff] }
 0x1ab   : > { %v1374_v49 = vpop.f32.mrb[4].mxu0  ;;  %v909_v5 = vld [vmem:[#allocation3 + $0x20] sm:$0xff] }
 0x1ac   : > { %v1054_v50 = vadd.f32 %v1374_v49, %v906_v48  ;;  %v1014_v52 = vpop.f32.mrb[5].mxu0 }
 0x1ad   : > { %v1053_v53 = vadd.f32 %v1014_v52, %v905_v51 }
 0x1ae   : > { %1062 = vst.msk [vmem:[#allocation3 + $0x8] sm:$0xff] %vm222_vm1, %v1054_v50 }
 0x1af   : > { %1061 = vst.msk [vmem:[#allocation3] sm:$0xff] %vm222_vm1, %v1053_v53 }
 0x1b0   : > { %v1367_v55 = vpop.f32.mrb[10].mxu1 }
 0x1b1   : > { %v776_v56 = vadd.f32 %v1367_v55, %v628_v54  ;;  %v760_v58 = vpop.f32.mrb[11].mxu1 }
 0x1b2   : > { %v775_v59 = vadd.f32 %v760_v58, %v627_v57 }
 0x1b3   : > { %784 = vst.msk [vmem:[#allocation3 + $0x38] sm:$0xff] %vm222_vm1, %v776_v56 }
 0x1b4   : > { %783 = vst.msk [vmem:[#allocation3 + $0x30] sm:$0xff] %vm222_vm1, %v775_v59 }
 0x1b5   : > { %v1074_v16 = vld [vmem:[#allocation3 + $0x8] sm:$0xff] (!%p1303_p10) }
 0x1b6   : > { %v1073_v14 = vld [vmem:[#allocation3] sm:$0xff] (!%p1303_p10)  ;;  %1082 = vst.msk [vmem:[%s1599_s6 + $0x8] sm:$0xff] (!%p1303_p10), %vm222_vm1, %v1074_v16 }
 0x1b7   : > { %1081 = vst.msk [vmem:[%s1599_s6] sm:$0xff] (!%p1303_p10), %vm222_vm1, %v1073_v14 }
 0x1b8   : > { %v1377_v61 = vpop.f32.mrb[6].mxu0 }
 0x1b9   : > { %v1056_v62 = vadd.f32 %v1377_v61, %v908_v60  ;;  %v1024_v0 = vpop.f32.mrb[7].mxu0 }
 0x1ba   : > { %v1055_v1 = vadd.f32 %v1024_v0, %v907_v63  ;;  %v912_v8 = vld [vmem:[#allocation3 + $0x38] sm:$0xff] }
 0x1bb   : > { %1064 = vst.msk [vmem:[#allocation3 + $0x18] sm:$0xff] %vm222_vm1, %v1056_v62  ;;  %v911_v11 = vld [vmem:[#allocation3 + $0x30] sm:$0xff] }
 0x1bc   : > { %1063 = vst.msk [vmem:[#allocation3 + $0x10] sm:$0xff] %vm222_vm1, %v1055_v1 }
 0x1c0   : > { %v1380_v3 = vpop.f32.mrb[8].mxu0 }
 0x1c1   : > { %v1058_v4 = vadd.f32 %v1380_v3, %v910_v2  ;;  %v1034_v6 = vpop.f32.mrb[9].mxu0 }
 0x1c2   : > { %v1057_v7 = vadd.f32 %v1034_v6, %v909_v5  ;;  %v1076_v18 = vld [vmem:[#allocation3 + $0x18] sm:$0xff] (!%p1303_p10) }
 0x1c3   : > { %1066 = vst.msk [vmem:[#allocation3 + $0x28] sm:$0xff] %vm222_vm1, %v1058_v4  ;;  %v1075_v17 = vld [vmem:[#allocation3 + $0x10] sm:$0xff] (!%p1303_p10)  ;;  %1084 = vst.msk [vmem:[%s1599_s6 + $0x18] sm:$0xff] (!%p1303_p10), %vm222_vm1, %v1076_v18 }
 0x1c4   : > { %1065 = vst.msk [vmem:[#allocation3 + $0x20] sm:$0xff] %vm222_vm1, %v1057_v7  ;;  %1083 = vst.msk [vmem:[%s1599_s6 + $0x10] sm:$0xff] (!%p1303_p10), %vm222_vm1, %v1075_v17 }
 0x1c6   : > { %1072 = sbr.rel (%p1303_p10) target bundleno = 469 (0x1d5), region = 36 }
 0x1c8   : > { %v1383_v9 = vpop.f32.mrb[10].mxu0 }
 0x1c9   : > { %v1060_v10 = vadd.f32 %v1383_v9, %v912_v8  ;;  %v1044_v12 = vpop.f32.mrb[11].mxu0 }
 0x1ca   : > { %v1059_v13 = vadd.f32 %v1044_v12, %v911_v11  ;;  %v1078_v20 = vld [vmem:[#allocation3 + $0x28] sm:$0xff] (!%p1303_p10) }
 0x1cb   : > { %1068 = vst.msk [vmem:[#allocation3 + $0x38] sm:$0xff] %vm222_vm1, %v1060_v10  ;;  %v1077_v19 = vld [vmem:[#allocation3 + $0x20] sm:$0xff] (!%p1303_p10)  ;;  %1086 = vst.msk [vmem:[%s1599_s6 + $0x28] sm:$0xff] (!%p1303_p10), %vm222_vm1, %v1078_v20 }
 0x1cc   : > { %1067 = vst.msk [vmem:[#allocation3 + $0x30] sm:$0xff] %vm222_vm1, %v1059_v13  ;;  %1085 = vst.msk [vmem:[%s1599_s6 + $0x20] sm:$0xff] (!%p1303_p10), %vm222_vm1, %v1077_v19 }
 0x1d2   : > { %v1080_v22 = vld [vmem:[#allocation3 + $0x38] sm:$0xff] }
 0x1d3   : > { %v1079_v21 = vld [vmem:[#allocation3 + $0x30] sm:$0xff]  ;;  %1088 = vst.msk [vmem:[%s1599_s6 + $0x38] sm:$0xff] %vm222_vm1, %v1080_v22 }
 0x1d4   : > { %1087 = vst.msk [vmem:[%s1599_s6 + $0x30] sm:$0xff] %vm222_vm1, %v1079_v21 }
 0x1d5 PF: > { %s12_s15 = sadd.s32 1, %s1520_s15   ;;  %s1944_s9 = smov %s1508_s12 }
 0x1d6   : > { %p9_p11 = scmp.ge.s32.totalorder %s12_s15, 50   ;;  %s1945_s10 = smov %s1512_s13 }
 0x1d7   : > { %s1946_s11 = smov %s1516_s14  ;;  %s1947_s12 = smov %s1951_s16 }
 0x1d8   : > { %s1948_s13 = smov %s1955_s17  ;;  %s1949_s14 = smov %s1959_s18 }
 0x1d9   :  { %11 = sbr.rel (!%p9_p11) target bundleno = 4 (0x4), region = 76 }

</bundles_post_ra>
